<compile_context>
chip_gen: v6e
topology: v6e:2x2x1
jax: 0.10.0
libtpu: 0.0.40
codegen_flags: <defaults>
</compile_context>

<pallas_src>
import functools

import jax
import jax.numpy as jnp
import numpy as np
from jax.experimental import pallas as pl
from jax.experimental.pallas import tpu as pltpu


def tv_block_kernel(x_ref, o_ref, *, planes, plane_tile, ragged):
    """One block of image planes -> one (1, 8, 128) tile of partial sums.

    x_ref : (TP, H, W) VMEM block in the input's native dtype.
    o_ref : (1, 8, 128) f32 VMEM block; lane 0 holds the h_tv partial sum,
            lane 1 holds the w_tv partial sum (other lanes are zero).
    """
    x = x_ref[...].astype(jnp.float32)          # in-kernel upcast (VPU)
    _, h, w = x.shape

    if ragged:
        # The last block may read past the end of the plane axis (the padded
        # region of the VMEM buffer is unspecified).  Zero those planes: an
        # all-zero plane contributes exactly 0 to both TV sums.
        first = pl.program_id(0) * plane_tile
        plane_idx = first + jax.lax.broadcasted_iota(jnp.int32, x.shape, 0)
        x = jnp.where(plane_idx < planes, x, 0.0)

    if h > 1:
        dh = x[:, 1:, :] - x[:, :-1, :]          # diff along H (sublanes)
        h_partial = jnp.sum(dh * dh)
    else:
        h_partial = jnp.float32(0.0)

    if w > 1:
        dw = x[:, :, 1:] - x[:, :, :-1]          # diff along W (lanes)
        w_partial = jnp.sum(dw * dw)
    else:
        w_partial = jnp.float32(0.0)

    # Pack the two scalars into this block's private output tile.
    lane = jax.lax.broadcasted_iota(jnp.int32, o_ref.shape, 2)
    o_ref[...] = jnp.where(
        lane == 0, h_partial, jnp.where(lane == 1, w_partial, 0.0)
    ).astype(jnp.float32)


def total_variance_loss(x, *, plane_tile=None, target_block_bytes=4 << 20):
    """Pallas equivalent of TotalVarianceLoss.forward for NCHW `x`."""
    N, C, H, W = x.shape
    count_h = C * (H - 1) * W                    # get_size(x[:, :, 1:, :])
    count_w = C * H * (W - 1)                    # get_size(x[:, :, :, 1:])

    planes = N * C
    xr = x.reshape(planes, H, W)                 # metadata reshape, native dtype

    if plane_tile is None:
        plane_bytes = H * W * xr.dtype.itemsize
        # Largest block (in native dtype) under ~4 MiB: amortizes the per-step
        # overhead while double-buffering comfortably inside the raised VMEM
        # limit on v5e / v6e / v7x.
        plane_tile = max(1, min(planes, target_block_bytes // plane_bytes))
        # TODO(synk): if a single plane exceeds the budget (very large H*W),
        # add an H-tiling grid axis with a 1-row halo instead of one huge block.
    plane_tile = int(min(plane_tile, planes))

    num_blocks = pl.cdiv(planes, plane_tile)
    ragged = (planes % plane_tile) != 0          # mask tail in-kernel, no jnp.pad

    kernel = functools.partial(
        tv_block_kernel, planes=planes, plane_tile=plane_tile, ragged=ragged)

    partials = pl.pallas_call(
        kernel,
        out_shape=jax.ShapeDtypeStruct((num_blocks, 8, 128), jnp.float32),
        grid=(num_blocks,),
        in_specs=[pl.BlockSpec((plane_tile, H, W), lambda i: (i, 0, 0))],
        out_specs=pl.BlockSpec((1, 8, 128), lambda i: (i, 0, 0)),
        compiler_params=pltpu.CompilerParams(
            dimension_semantics=("parallel",),   # per-block outputs -> v7x 2 TCs
            vmem_limit_bytes=48 * 1024 * 1024,
        ),
    )(xr)

    # Tiny final reduction + normalization in plain JAX.
    h_tv = jnp.sum(partials[:, 0, 0])
    w_tv = jnp.sum(partials[:, 0, 1])
    return 2.0 * (h_tv / count_h + w_tv / count_w) / N


def total_variance_loss_ref(x):
    """Plain-JAX reference (mirrors the PyTorch module exactly)."""
    N, C, H, W = x.shape
    count_h = C * (H - 1) * W
    count_w = C * H * (W - 1)
    h_tv = jnp.sum((x[:, :, 1:, :] - x[:, :, :-1, :]) ** 2)
    w_tv = jnp.sum((x[:, :, :, 1:] - x[:, :, :, :-1]) ** 2)
    return 2.0 * (h_tv / count_h + w_tv / count_w) / N


if __name__ == "__main__":
    key = jax.random.PRNGKey(0)
    x = jax.random.uniform(key, (2, 4, 16, 16), jnp.float32)   # NCHW

    ref = total_variance_loss_ref(x)

    tv = jax.jit(total_variance_loss)

    # Default tiling (single grid step at this toy size).
    loss = tv(x)
    jax.block_until_ready(loss)
    np.testing.assert_allclose(np.asarray(loss), np.asarray(ref),
                               rtol=1e-5, atol=1e-6)

    # Force a multi-step grid with a ragged tail (8 planes, tile of 3) to
    # exercise the in-kernel plane masking + per-block partial outputs.
    tv_tiled = jax.jit(total_variance_loss, static_argnames=("plane_tile",))
    loss2 = tv_tiled(x, plane_tile=3)
    jax.block_until_ready(loss2)
    np.testing.assert_allclose(np.asarray(loss2), np.asarray(ref),
                               rtol=1e-5, atol=1e-6)

    # Native-dtype streaming path: bf16 input is upcast to f32 inside the kernel.
    x_bf16 = x.astype(jnp.bfloat16)
    loss3 = tv(x_bf16)
    jax.block_until_ready(loss3)
    np.testing.assert_allclose(np.asarray(loss3), np.asarray(ref), rtol=2e-2)

    print("KERNEL_OK")
</pallas_src>

<mosaic_0001>
module attributes {stable_mosaic.version = 11 : i64} {
  func.func @tv_block_kernel(%arg0: i32, %arg1: memref<8x16x16xf32, #tpu.memory_space<vmem>>, %arg2: memref<1x8x128xf32, #tpu.memory_space<vmem>>) attributes {dimension_semantics = [#tpu.dimension_semantics<parallel>], iteration_bounds = array<i64: 1>, scalar_prefetch = 0 : i64, scratch_operands = 0 : i64, tpu.core_type = #tpu.core_type<tc>, window_params = [{transform_indices = @transform_0, window_bounds = array<i64: 8, 16, 16>}, {transform_indices = @transform_1, window_bounds = array<i64: 1, 8, 128>}]} {
    %c0 = arith.constant 0 : index
    %c0_0 = arith.constant 0 : index
    %c0_1 = arith.constant 0 : index
    %0 = vector.load %arg1[%c0, %c0_0, %c0_1] : memref<8x16x16xf32, #tpu.memory_space<vmem>>, vector<8x16x16xf32>
    %1 = vector.extract_strided_slice %0 {offsets = [0, 1, 0], sizes = [8, 15, 16], strides = [1, 1, 1]} : vector<8x16x16xf32> to vector<8x15x16xf32>
    %2 = vector.extract_strided_slice %0 {offsets = [0, 0, 0], sizes = [8, 15, 16], strides = [1, 1, 1]} : vector<8x16x16xf32> to vector<8x15x16xf32>
    %3 = arith.subf %1, %2 : vector<8x15x16xf32>
    %4 = arith.mulf %3, %3 : vector<8x15x16xf32>
    %5 = vector.shape_cast %4 : vector<8x15x16xf32> to vector<1x8x15x16xf32>
    %cst = arith.constant dense<0.000000e+00> : vector<1xf32>
    %6 = vector.multi_reduction <add>, %5, %cst [1, 2, 3] : vector<1x8x15x16xf32> to vector<1xf32>
    %7 = vector.shape_cast %6 : vector<1xf32> to vector<1x1x1x1xf32>
    %8 = vector.extract %7[0, 0, 0, 0] : f32 from vector<1x1x1x1xf32>
    %9 = vector.extract_strided_slice %0 {offsets = [0, 0, 1], sizes = [8, 16, 15], strides = [1, 1, 1]} : vector<8x16x16xf32> to vector<8x16x15xf32>
    %10 = vector.extract_strided_slice %0 {offsets = [0, 0, 0], sizes = [8, 16, 15], strides = [1, 1, 1]} : vector<8x16x16xf32> to vector<8x16x15xf32>
    %11 = arith.subf %9, %10 : vector<8x16x15xf32>
    %12 = arith.mulf %11, %11 : vector<8x16x15xf32>
    %13 = vector.shape_cast %12 : vector<8x16x15xf32> to vector<1x8x16x15xf32>
    %cst_2 = arith.constant dense<0.000000e+00> : vector<1xf32>
    %14 = vector.multi_reduction <add>, %13, %cst_2 [1, 2, 3] : vector<1x8x16x15xf32> to vector<1xf32>
    %15 = vector.shape_cast %14 : vector<1xf32> to vector<1x1x1x1xf32>
    %16 = vector.extract %15[0, 0, 0, 0] : f32 from vector<1x1x1x1xf32>
    %17 = tpu.iota {dimensions = array<i32: 2>} : vector<1x8x128xi32>
    %c0_i32 = arith.constant 0 : i32
    %18 = vector.broadcast %c0_i32 : i32 to vector<1x8x128xi32>
    %19 = arith.cmpi eq, %17, %18 : vector<1x8x128xi32>
    %c1_i32 = arith.constant 1 : i32
    %20 = vector.broadcast %c1_i32 : i32 to vector<1x8x128xi32>
    %21 = arith.cmpi eq, %17, %20 : vector<1x8x128xi32>
    %cst_3 = arith.constant 0.000000e+00 : f32
    %22 = vector.broadcast %16 : f32 to vector<1x8x128xf32>
    %23 = vector.broadcast %cst_3 : f32 to vector<1x8x128xf32>
    %24 = arith.select %21, %22, %23 : vector<1x8x128xi1>, vector<1x8x128xf32>
    %25 = vector.broadcast %8 : f32 to vector<1x8x128xf32>
    %26 = arith.select %19, %25, %24 : vector<1x8x128xi1>, vector<1x8x128xf32>
    %c0_4 = arith.constant 0 : index
    %c0_5 = arith.constant 0 : index
    %c0_6 = arith.constant 0 : index
    %27 = vector.load %arg2[%c0_4, %c0_5, %c0_6] : memref<1x8x128xf32, #tpu.memory_space<vmem>>, vector<1x8x128xf32>
    tpu.vector_store %arg2[%c0_4, %c0_5, %c0_6], %26 {strides = array<i32>} : memref<1x8x128xf32, #tpu.memory_space<vmem>>, vector<1x8x128xf32>,
    return
  }
  func.func @transform_0(%arg0: i32) -> (i32, i32, i32) {
    %c0_i32 = arith.constant 0 : i32
    %c0_i32_0 = arith.constant 0 : i32
    %c0_i32_1 = arith.constant 0 : i32
    return %arg0, %c0_i32, %c0_i32_0 : i32, i32, i32
  }
  func.func @transform_1(%arg0: i32) -> (i32, i32, i32) {
    %c0_i32 = arith.constant 0 : i32
    %c0_i32_0 = arith.constant 0 : i32
    %c0_i32_1 = arith.constant 0 : i32
    return %arg0, %c0_i32, %c0_i32_0 : i32, i32, i32
  }
}

</mosaic_0001>

<bundles_post_ra>
// kernel: total_variance_loss.1
= control target key start
LH: loop header
LB: loop body
LE: loop exit
PB: predicated region body
PF: predicated region fallthrough
CT: control target
= control target key end

     0   :  { %6 = vsyncpa [#allocation3], 0  ;;  %s456_s6 = smov [#allocation2]   ;;  %s637_s0 = inlined_call_operand.hbm [shape: f32[8,16,16], index: 0, kind: input, shape index: {}]   ;;  %s638_s1 = inlined_call_operand.vmem [shape: f32[1,8,128], index: 1, kind: output, shape index: {}]  }
   0x1   :  { %s12_s7 = sshll.u32 %s456_s6, 4  ;;  %s13_s7 = int_to_ptr.vmem [resolvable:$true] %s12_s7 }
   0x2   :  { %s442_s8 = scalar_lea.vmem %s13_s7, 2048  ;;  %p447_p1 = scmp.lt.s32.totalorder %s13_s7, %s13_s7 }
   0x3   :  { %p443_p0 = scmp.ne.s32.totalorder %s13_s7, %s442_s8  ;;  %p448_p2 = scmp.lt.s32.totalorder %s442_s8, %s442_s8 }
   0x5   :  { %p449_p3 = por %p448_p2, %p447_p1 }
   0x7   :  { %p450_p4 = pnand %p449_p3, %p443_p0 }
   0x9   :  { %453 = shalt.err (!%p450_p4)
}
   0xa   :  { %s457_s9 = smov 128   ;;  %s458_s10 = smov 8  }
   0xb   :  { %18 = dma.hbm_to_vmem [thread:$0]  %s637_s0, 2048, %s13_s7, [#allocation3], %s457_s9, %s457_s9, %s458_s10  }
   0xc   :  { %454 = dma.done.wait [#allocation3], 2048  }
   0xd   :  { %455 = vsyncadd [#allocation3], 4294965248  ;;  %v474_v0 = vld [vmem:[#allocation2] sm:$0xff]  ;;  %v476_v1 = vld [vmem:[#allocation2 + $0x10] sm:$0xff]  ;;  %s459_s13 = smov 1   ;;  %vm54_vm0 = vcmask 1040384  }
   0xe   :  { %226 = vrot.lane.b32.xlu0 %v474_v0, %s459_s13  ;;  %230 = vrot.lane.b32.xlu1 %v476_v1, %s459_s13  ;;  %v480_v2 = vld [vmem:[#allocation2 + $0x8] sm:$0xff]  ;;  %v482_v3 = vld [vmem:[#allocation2 + $0x18] sm:$0xff]  ;;  %v486_v4 = vld [vmem:[#allocation2 + $0x20] sm:$0xff]  ;;  %v55_v16 = vrot.slane %v474_v0, 7  ;;  %v58_v18 = vrot.slane %v476_v1, 7  ;;  %vm143_vm1 = vcmask 1046528  }
   0xf   :  { %v488_v5 = vld [vmem:[#allocation2 + $0x28] sm:$0xff]  ;;  %v492_v6 = vld [vmem:[#allocation2 + $0x30] sm:$0xff]  ;;  %v494_v7 = vld [vmem:[#allocation2 + $0x38] sm:$0xff]  ;;  %v56_v17 = vrot.slane %v480_v2, 7  ;;  %v59_v20 = vrot.slane %v482_v3, 7  ;;  %v61_v28 = vrot.slane %v486_v4, 7 }
  0x10   :  { %v498_v8 = vld [vmem:[#allocation2 + $0x40] sm:$0xff]  ;;  %v500_v9 = vld [vmem:[#allocation2 + $0x48] sm:$0xff]  ;;  %v504_v10 = vld [vmem:[#allocation2 + $0x50] sm:$0xff]  ;;  %v95_v21 = vsub.f32 %v474_v0, %v55_v16  ;;  %v97_v25 = vsub.f32 %v476_v1, %v58_v18  ;;  %v62_v29 = vrot.slane %v488_v5, 7  ;;  %vm184_vm2 = vcmask 130048   ;;  %s460_s0 = smov 127  }
  0x11   :  { %v506_v11 = vld [vmem:[#allocation2 + $0x58] sm:$0xff]  ;;  %v510_v12 = vld [vmem:[#allocation2 + $0x60] sm:$0xff]  ;;  %v512_v13 = vld [vmem:[#allocation2 + $0x68] sm:$0xff]  ;;  %v57_v19 = vsel %vm54_vm0, %v55_v16, %v56_v17  ;;  %v60_v23 = vsel %vm54_vm0, %v58_v18, %v59_v20  ;;  %vm186_vm3 = vcmask 129024   ;;  %v99_v35 = vsub.f32 %v486_v4, %v61_v28 }
  0x12   :  { %228 = vrot.lane.b32.xlu0 %v480_v2, %s459_s13  ;;  %232 = vrot.lane.b32.xlu1 %v482_v3, %s459_s13  ;;  %v516_v14 = vld [vmem:[#allocation2 + $0x70] sm:$0xff]  ;;  %v518_v15 = vld [vmem:[#allocation2 + $0x78] sm:$0xff]  ;;  %v96_v22 = vsub.f32 %v480_v2, %v57_v19  ;;  %v111_v24 = vmul.f32 %v95_v21, %v95_v21  ;;  %v98_v27 = vsub.f32 %v482_v3, %v60_v23  ;;  %v64_v40 = vrot.slane %v492_v6, 7 }
  0x13   :  { %v113_v31 = vmul.f32 %v97_v25, %v97_v25  ;;  %v63_v34 = vsel %vm54_vm0, %v61_v28, %v62_v29  ;;  %v65_v41 = vrot.slane %v494_v7, 7  ;;  %v115_v49 = vmul.f32 %v99_v35, %v99_v35 }
  0x14   :  { %v112_v26 = vmul.f32 %v96_v22, %v96_v22  ;;  %v144_v30 = vrot.slane %v111_v24, 1  ;;  %v114_v33 = vmul.f32 %v98_v27, %v98_v27  ;;  %v100_v39 = vsub.f32 %v488_v5, %v63_v34 }
  0x15   :  { %v147_v36 = vrot.slane %v113_v31, 1  ;;  %v66_v51 = vsel %vm54_vm0, %v64_v40, %v65_v41  ;;  %v150_v60 = vrot.slane %v115_v49, 1  ;;  %v101_v62 = vsub.f32 %v492_v6, %v64_v40 }
  0x16   :  { %234 = vrot.lane.b32.xlu0 %v486_v4, %s459_s13  ;;  %236 = vrot.lane.b32.xlu1 %v488_v5, %s459_s13  ;;  %v145_v32 = vrot.slane %v112_v26, 1  ;;  %v148_v38 = vrot.slane %v114_v33, 1  ;;  %v116_v50 = vmul.f32 %v100_v39, %v100_v39  ;;  %v102_v63 = vsub.f32 %v494_v7, %v66_v51 }
  0x17   :  { %v117_v23 = vmul.f32 %v101_v62, %v101_v62  ;;  %vm370_vm4 = vcmask 121856  }
  0x18   :  { %v146_v37 = vsel %vm143_vm1, %v144_v30, %v145_v32  ;;  %v187_v45 = vsel %vm186_vm3, %v145_v32, 0.0  ;;  %v149_v48 = vsel %vm143_vm1, %v147_v36, %v148_v38  ;;  %v151_v61 = vrot.slane %v116_v50, 1 }
  0x19   :  { %v185_v44 = vsel %vm184_vm2, %v146_v37, 0.0  ;;  %v189_v56 = vsel %vm184_vm2, %v149_v48, 0.0  ;;  %v118_v24 = vmul.f32 %v102_v63, %v102_v63  ;;  %v70_v36 = vrot.slane %v504_v10, 7 }
  0x1a   :  { %238 = vrot.lane.b32.xlu0 %v492_v6, %s459_s13  ;;  %240 = vrot.lane.b32.xlu1 %v494_v7, %s459_s13  ;;  %v188_v53 = vadd.f32 %v187_v45, %v185_v44  ;;  %v152_v22 = vsel %vm143_vm1, %v150_v60, %v151_v61  ;;  %v71_v37 = vrot.slane %v506_v11, 7 }
  0x1b   :  { %v193_v30 = vsel %vm184_vm2, %v152_v22, 0.0  ;;  %v154_v33 = vrot.slane %v118_v24, 1 }
  0x1c   :  { %v190_v17 = vadd.f32 %v189_v56, %v188_v53  ;;  %v105_v56 = vsub.f32 %v504_v10, %v70_v36 }
  0x1e   :  { %242 = vrot.lane.b32.xlu0 %v498_v8, %s459_s13  ;;  %244 = vrot.lane.b32.xlu1 %v500_v9, %s459_s13 }
  0x22   :  { %246 = vrot.lane.b32.xlu0 %v504_v10, %s459_s13  ;;  %248 = vrot.lane.b32.xlu1 %v506_v11, %s459_s13 }
  0x26   :  { %250 = vrot.lane.b32.xlu0 %v510_v12, %s459_s13  ;;  %252 = vrot.lane.b32.xlu1 %v512_v13, %s459_s13 }
  0x2a   :  { %254 = vrot.lane.b32.xlu0 %v516_v14, %s459_s13  ;;  %256 = vrot.lane.b32.xlu1 %v518_v15, %s459_s13 }
  0x80   :  { %v227_v42 = vpop.permute.xlu0 %226  ;;  %v231_v43 = vpop.permute.xlu1 %230 }
  0x81   :  { %v274_v46 = vsub.f32 %v474_v0, %v227_v42  ;;  %v276_v47 = vsub.f32 %v476_v1, %v231_v43  ;;  %v67_v0 = vrot.slane %v498_v8, 7  ;;  %v68_v1 = vrot.slane %v500_v9, 7 }
  0x83   :  { %v290_v52 = vmul.f32 %v274_v46, %v274_v46  ;;  %v292_v57 = vmul.f32 %v276_v47, %v276_v47  ;;  %v69_v25 = vsel %vm54_vm0, %v67_v0, %v68_v1  ;;  %v103_v34 = vsub.f32 %v498_v8, %v67_v0 }
  0x84   :  { %v229_v54 = vpop.permute.xlu0 %228  ;;  %v233_v55 = vpop.permute.xlu1 %232  ;;  %v104_v35 = vsub.f32 %v500_v9, %v69_v25  ;;  %v72_v47 = vsel %vm54_vm0, %v70_v36, %v71_v37  ;;  %v199_v0 = vsel %vm186_vm3, %v154_v33, 0.0 }
  0x85   :  { %v275_v58 = vsub.f32 %v480_v2, %v229_v54  ;;  %322 = vrot.lane.b32.xlu0 %v290_v52, %s460_s0  ;;  %v277_v59 = vsub.f32 %v482_v3, %v233_v55  ;;  %v191_v2 = vsel %vm186_vm3, %v148_v38, 0.0  ;;  %v119_v45 = vmul.f32 %v103_v34, %v103_v34 }
  0x86   :  { %v192_v27 = vadd.f32 %v191_v2, %v190_v17  ;;  %v120_v46 = vmul.f32 %v104_v35, %v104_v35  ;;  %v121_v17 = vmul.f32 %v105_v56, %v105_v56 }
  0x87   :  { %v291_v16 = vmul.f32 %v275_v58, %v275_v58  ;;  %v293_v20 = vmul.f32 %v277_v59, %v277_v59  ;;  %v156_v54 = vrot.slane %v119_v45, 1  ;;  %v73_v58 = vrot.slane %v510_v12, 7 }
  0x88   :  { %v235_v18 = vpop.permute.xlu0 %234  ;;  %v237_v19 = vpop.permute.xlu1 %236  ;;  %v194_v39 = vadd.f32 %v193_v30, %v192_v27  ;;  %v157_v55 = vrot.slane %v120_v46, 1  ;;  %v74_v59 = vrot.slane %v512_v13, 7  ;;  %v76_v30 = vrot.slane %v516_v14, 7 }
  0x89   :  { %326 = vrot.lane.b32.xlu0 %v292_v57, %s460_s0  ;;  %324 = vrot.lane.b32.xlu1 %v291_v16, %s460_s0  ;;  %v278_v3 = vsub.f32 %v486_v4, %v235_v18  ;;  %v279_v21 = vsub.f32 %v488_v5, %v237_v19  ;;  %v153_v5 = vrot.slane %v117_v23, 1  ;;  %v106_v57 = vsub.f32 %v506_v11, %v72_v47 }
  0x8a   :  { %v75_v19 = vsel %vm54_vm0, %v73_v58, %v74_v59 }
  0x8b   :  { %v294_v26 = vmul.f32 %v278_v3, %v278_v3  ;;  %v295_v31 = vmul.f32 %v279_v21, %v279_v21  ;;  %v155_v44 = vsel %vm143_vm1, %v153_v5, %v154_v33  ;;  %v122_v18 = vmul.f32 %v106_v57, %v106_v57 }
  0x8c   :  { %v239_v28 = vpop.permute.xlu0 %238  ;;  %v241_v29 = vpop.permute.xlu1 %240  ;;  %v197_v52 = vsel %vm184_vm2, %v155_v44, 0.0  ;;  %v203_v5 = vsel %vm186_vm3, %v157_v55, 0.0 }
  0x8d   :  { %328 = vrot.lane.b32.xlu1 %v293_v20, %s460_s0  ;;  %v280_v32 = vsub.f32 %v492_v6, %v239_v28  ;;  %330 = vrot.lane.b32.xlu0 %v294_v26, %s460_s0  ;;  %v281_v4 = vsub.f32 %v494_v7, %v241_v29  ;;  %v195_v6 = vsel %vm186_vm3, %v151_v61, 0.0  ;;  %v159_v26 = vrot.slane %v121_v17, 1 }
  0x8e   :  { %v196_v49 = vadd.f32 %v195_v6, %v194_v39  ;;  %v160_v27 = vrot.slane %v122_v18, 1  ;;  %v107_v28 = vsub.f32 %v510_v12, %v73_v58  ;;  %v108_v29 = vsub.f32 %v512_v13, %v75_v19 }
  0x8f   :  { %v296_v38 = vmul.f32 %v280_v32, %v280_v32  ;;  %v297_v42 = vmul.f32 %v281_v4, %v281_v4  ;;  %v109_v39 = vsub.f32 %v516_v14, %v76_v30 }
  0x90   :  { %v243_v40 = vpop.permute.xlu0 %242  ;;  %v245_v41 = vpop.permute.xlu1 %244  ;;  %v198_v61 = vadd.f32 %v197_v52, %v196_v49  ;;  %v161_v34 = vsel %vm143_vm1, %v159_v26, %v160_v27  ;;  %v123_v35 = vmul.f32 %v107_v28, %v107_v28  ;;  %v124_v36 = vmul.f32 %v108_v29, %v108_v29 }
  0x91   :  { %332 = vrot.lane.b32.xlu1 %v295_v31, %s460_s0  ;;  %v282_v7 = vsub.f32 %v498_v8, %v243_v40  ;;  %334 = vrot.lane.b32.xlu0 %v296_v38, %s460_s0  ;;  %v283_v43 = vsub.f32 %v500_v9, %v245_v41  ;;  %v77_v31 = vrot.slane %v518_v15, 7  ;;  %v205_v37 = vsel %vm184_vm2, %v161_v34, 0.0 }
  0x92   :  { %v200_v20 = vadd.f32 %v199_v0, %v198_v61  ;;  %v162_v38 = vrot.slane %v123_v35, 1  ;;  %v163_v41 = vrot.slane %v124_v36, 1 }
  0x93   :  { %v298_v48 = vmul.f32 %v282_v7, %v282_v7  ;;  %v299_v53 = vmul.f32 %v283_v43, %v283_v43  ;;  %v125_v7 = vmul.f32 %v109_v39, %v109_v39 }
  0x94   :  { %v247_v50 = vpop.permute.xlu0 %246  ;;  %v249_v51 = vpop.permute.xlu1 %248  ;;  %v164_v44 = vsel %vm143_vm1, %v162_v38, %v163_v41 }
  0x95   :  { %336 = vrot.lane.b32.xlu1 %v297_v42, %s460_s0  ;;  %v284_v8 = vsub.f32 %v504_v10, %v247_v50  ;;  %338 = vrot.lane.b32.xlu0 %v298_v48, %s460_s0  ;;  %v285_v9 = vsub.f32 %v506_v11, %v249_v51  ;;  %v158_v11 = vsel %vm143_vm1, %v156_v54, %v157_v55  ;;  %v207_v42 = vsel %vm186_vm3, %v160_v27, 0.0 }
  0x96   :  { %v201_v22 = vsel %vm184_vm2, %v158_v11, 0.0  ;;  %v209_v46 = vsel %vm184_vm2, %v164_v44, 0.0  ;;  %v165_v47 = vrot.slane %v125_v7, 1  ;;  %v211_v50 = vsel %vm186_vm3, %v163_v41, 0.0 }
  0x97   :  { %v300_v60 = vmul.f32 %v284_v8, %v284_v8  ;;  %v301_v1 = vmul.f32 %v285_v9, %v285_v9  ;;  %v202_v4 = vadd.f32 %v201_v22, %v200_v20 }
  0x98   :  { %v251_v62 = vpop.permute.xlu0 %250  ;;  %v253_v63 = vpop.permute.xlu1 %252 }
  0x99   :  { %340 = vrot.lane.b32.xlu1 %v299_v53, %s460_s0  ;;  %v286_v16 = vsub.f32 %v510_v12, %v251_v62  ;;  %342 = vrot.lane.b32.xlu0 %v300_v60, %s460_s0  ;;  %v287_v10 = vsub.f32 %v512_v13, %v253_v63  ;;  %v78_v12 = vsel %vm54_vm0, %v76_v30, %v77_v31 }
  0x9a   :  { %v204_v13 = vadd.f32 %v203_v5, %v202_v4  ;;  %v110_v40 = vsub.f32 %v518_v15, %v78_v12 }
  0x9b   :  { %v302_v2 = vmul.f32 %v286_v16, %v286_v16  ;;  %v303_v23 = vmul.f32 %v287_v10, %v287_v10 }
  0x9c   :  { %v255_v3 = vpop.permute.xlu0 %254  ;;  %v257_v21 = vpop.permute.xlu1 %256  ;;  %v206_v6 = vadd.f32 %v205_v37, %v204_v13  ;;  %v126_v43 = vmul.f32 %v110_v40, %v110_v40 }
  0x9d   :  { %344 = vrot.lane.b32.xlu1 %v301_v1, %s460_s0  ;;  %v288_v24 = vsub.f32 %v516_v14, %v255_v3  ;;  %346 = vrot.lane.b32.xlu0 %v302_v2, %s460_s0  ;;  %v289_v25 = vsub.f32 %v518_v15, %v257_v21 }
  0x9e   :  { %v208_v45 = vadd.f32 %v207_v42, %v206_v6  ;;  %v166_v48 = vrot.slane %v126_v43, 1 }
  0x9f   :  { %v304_v32 = vmul.f32 %v288_v24, %v288_v24  ;;  %v305_v33 = vmul.f32 %v289_v25, %v289_v25 }
  0xa0   :  { %v210_v49 = vadd.f32 %v209_v46, %v208_v45  ;;  %v167_v14 = vsel %vm143_vm1, %v165_v47, %v166_v48  ;;  %v215_v53 = vsel %vm186_vm3, %v166_v48, 0.0 }
  0xa1   :  { %348 = vrot.lane.b32.xlu1 %v303_v23, %s460_s0  ;;  %350 = vrot.lane.b32.xlu0 %v304_v32, %s460_s0  ;;  %v213_v15 = vsel %vm184_vm2, %v167_v14, 0.0 }
  0xa2   :  { %v212_v51 = vadd.f32 %v211_v50, %v210_v49 }
  0xa4   :  { %v214_v52 = vadd.f32 %v213_v15, %v212_v51 }
  0xa5   :  { %352 = vrot.lane.b32.xlu1 %v305_v33, %s460_s0 }
  0xa6   :  { %v216_v8 = vadd.f32 %v215_v53, %v214_v52  ;;  %v411_v52 = vlaneseq }
  0xa8   :  { %v412_v53 = vand.u32 127, %v411_v52 }
  0xaa   :  { %vm414_vm5 = vcmp.eq.s32.totalorder %v412_v53, 1  ;;  %vm413_vm6 = vcmp.eq.s32.totalorder %v412_v53, 0 }
  0xc0   :  { %217 = vadd.xlane.f32.xlu0 %v216_v8 }
  0xf7   :  { %v323_v9 = vpop.permute.xlu0 %322 }
  0xf8   :  { %v371_v56 = vsel %vm370_vm4, %v323_v9, 0.0 }
  0xfb   :  { %v325_v54 = vpop.permute.xlu1 %324  ;;  %v327_v55 = vpop.permute.xlu0 %326 }
  0xfc   :  { %v372_v57 = vsel %vm370_vm4, %v325_v54, 0.0  ;;  %v374_v59 = vsel %vm370_vm4, %v327_v55, 0.0 }
  0xfd   :  { %v373_v58 = vadd.f32 %v372_v57, %v371_v56 }
  0xff   :  { %v375_v60 = vadd.f32 %v374_v59, %v373_v58  ;;  %v329_v61 = vpop.permute.xlu1 %328  ;;  %v331_v62 = vpop.permute.xlu0 %330 }
 0x100   :  { %v376_v63 = vsel %vm370_vm4, %v329_v61, 0.0  ;;  %v378_v0 = vsel %vm370_vm4, %v331_v62, 0.0 }
 0x101   :  { %v377_v1 = vadd.f32 %v376_v63, %v375_v60 }
 0x103   :  { %v379_v16 = vadd.f32 %v378_v0, %v377_v1  ;;  %v333_v10 = vpop.permute.xlu1 %332  ;;  %v335_v11 = vpop.permute.xlu0 %334 }
 0x104   :  { %v380_v17 = vsel %vm370_vm4, %v333_v10, 0.0  ;;  %v382_v18 = vsel %vm370_vm4, %v335_v11, 0.0 }
 0x105   :  { %v381_v19 = vadd.f32 %v380_v17, %v379_v16 }
 0x107   :  { %v383_v2 = vadd.f32 %v382_v18, %v381_v19  ;;  %v337_v20 = vpop.permute.xlu1 %336  ;;  %v339_v3 = vpop.permute.xlu0 %338 }
 0x108   :  { %v384_v21 = vsel %vm370_vm4, %v337_v20, 0.0  ;;  %v386_v22 = vsel %vm370_vm4, %v339_v3, 0.0 }
 0x109   :  { %v385_v23 = vadd.f32 %v384_v21, %v383_v2 }
 0x10b   :  { %v387_v24 = vadd.f32 %v386_v22, %v385_v23  ;;  %v341_v25 = vpop.permute.xlu1 %340  ;;  %v343_v26 = vpop.permute.xlu0 %342 }
 0x10c   :  { %v388_v27 = vsel %vm370_vm4, %v341_v25, 0.0  ;;  %v390_v28 = vsel %vm370_vm4, %v343_v26, 0.0 }
 0x10d   :  { %v389_v29 = vadd.f32 %v388_v27, %v387_v24 }
 0x10f   :  { %v391_v30 = vadd.f32 %v390_v28, %v389_v29  ;;  %v345_v31 = vpop.permute.xlu1 %344  ;;  %v347_v32 = vpop.permute.xlu0 %346 }
 0x110   :  { %v392_v4 = vsel %vm370_vm4, %v345_v31, 0.0  ;;  %v394_v5 = vsel %vm370_vm4, %v347_v32, 0.0 }
 0x111   :  { %v393_v33 = vadd.f32 %v392_v4, %v391_v30 }
 0x113   :  { %v395_v34 = vadd.f32 %v394_v5, %v393_v33  ;;  %v349_v35 = vpop.permute.xlu1 %348  ;;  %v351_v36 = vpop.permute.xlu0 %350 }
 0x114   :  { %v396_v12 = vsel %vm370_vm4, %v349_v35, 0.0  ;;  %v398_v13 = vsel %vm370_vm4, %v351_v36, 0.0 }
 0x115   :  { %v397_v37 = vadd.f32 %v396_v12, %v395_v34 }
 0x117   :  { %v399_v38 = vadd.f32 %v398_v13, %v397_v37  ;;  %v353_v39 = vpop.permute.xlu1 %352 }
 0x118   :  { %v400_v40 = vsel %vm370_vm4, %v353_v39, 0.0 }
 0x119   :  { %v401_v41 = vadd.f32 %v400_v40, %v399_v38 }
 0x11b   :  { %402 = vadd.xlane.f32.xlu1 %v401_v41 }
 0x149   :  { %v218_v6 = vpop.xlane.xlu0 %217 }
 0x14a   :  { %v219_v42 = vrot.slane %v218_v6, 4 }
 0x14c   :  { %v220_v7 = vadd.f32 %v219_v42, %v218_v6 }
 0x14e   :  { %v221_v43 = vrot.slane %v220_v7, 2 }
 0x150   :  { %v222_v44 = vadd.f32 %v221_v43, %v220_v7 }
 0x152   :  { %v223_v45 = vrot.slane %v222_v44, 1 }
 0x154   :  { %v224_v46 = vadd.f32 %v223_v45, %v222_v44 }
 0x156   :  { %425 = vpush %v224_v46 }
 0x187   :  { %s426_s14 = spop %425 }
 0x188   :  { %v417_v9 = vstv %s426_s14 }
 0x1a4   :  { %v403_v47 = vpop.xlane.xlu1 %402 }
 0x1a5   :  { %v404_v48 = vrot.slane %v403_v47, 4 }
 0x1a7   :  { %v405_v49 = vadd.f32 %v404_v48, %v403_v47 }
 0x1a9   :  { %v406_v50 = vrot.slane %v405_v49, 2 }
 0x1ab   :  { %v407_v14 = vadd.f32 %v406_v50, %v405_v49 }
 0x1ad   :  { %v408_v51 = vrot.slane %v407_v14, 1 }
 0x1af   :  { %v409_v15 = vadd.f32 %v408_v51, %v407_v14 }
 0x1b1   :  { %427 = vpush %v409_v15 }
 0x1e2   :  { %s428_s15 = spop %427 }
 0x1e3   :  { %v415_v8 = vstv %s428_s15 }
 0x1e4   :  { %v416_v54 = vsel %vm414_vm5, %v415_v8, 0.0 }
 0x1e5   :  { %v418_v55 = vsel %vm413_vm6, %v417_v9, %v416_v54 }
 0x1e6   :  { %419 = vst [vmem:[%s638_s1] sm:$0xff] %v418_v55 }
 0x1e7   :  { %424 = vsyncpa [#allocation3], 1 }

</bundles_post_ra>
